<compile_context>
chip_gen: v5e
topology: v5e:2x2
jax: 0.10.0
libtpu: 0.0.40
codegen_flags: <defaults>
</compile_context>

<pallas_src>
import functools

import jax
import jax.numpy as jnp
from jax.experimental import pallas as pl
from jax.experimental.pallas import tpu as pltpu


def _round_up(a, b):
    return ((a + b - 1) // b) * b


def _patch_pos_kernel(pos_ref, x_ref, tab_ref, aux_ref, o_ref, *, depth, n_slots):
    """pos_ref: (tm, 2*n_slots) f32  [lanes 0..n_slots-1 = 'from', n_slots..2n_slots-1 = 'to']
       x_ref  : (tm, lane)           lane-dense input slab
       tab_ref: (K, lane)            merged block-diagonal row+col embedding table
       aux_ref: (n_slots+1, K) f32   rows [0:n_slots] = 0/1 selector S (S[j, j*depth+d] = 1),
                                     row n_slots = within-block lane index (k % depth)
       o_ref  : (tm, lane)
    NOTE: in a partial last grid block the padded rows of pos/x hold stale VMEM garbage; the
    round/clip/compare path is safe on any value and the OOB output rows are masked on store.
    Do not reintroduce a dependence on padded values."""
    dd = float(depth)

    # _discretize: round(pos * discretize_depth)  (torch.round == jnp.round, half-to-even)
    p = jnp.round(pos_ref[...] * dd)                               # (tm, 2*n_slots)
    # _rounded_mean_positions: round((from + to) / 2), clamped to valid embedding rows.
    idx = jnp.round((p[:, :n_slots] + p[:, n_slots:]) * 0.5)       # (tm, n_slots)
    idx = jnp.clip(idx, 0.0, dd - 1.0)

    sel = aux_ref[0:n_slots, :]                                    # (n_slots, K) 0/1 selector
    within = aux_ref[n_slots:n_slots + 1, :]                       # (1, K) lane % depth

    # Lane-expand idx (rep[m, k] = idx[m, k // depth]) with one tiny MXU matmul instead of
    # n_slots XLU lane-broadcasts, then ONE compare builds the whole one-hot.  All values are
    # small exact integers; the 0.5 tolerance makes the compare robust to matmul rounding.
    rep = jnp.dot(idx, sel, preferred_element_type=jnp.float32)    # (tm, K)
    one_hot = (jnp.abs(rep - within) < 0.5).astype(tab_ref.dtype)  # (tm, K)

    # Single MXU matmul gathers (row_emb + col_emb) for every folded sub-row, lane-dense.
    emb = jnp.dot(one_hot, tab_ref[...], preferred_element_type=jnp.float32)   # (tm, lane)
    o_ref[...] = (x_ref[...].astype(jnp.float32) + emb).astype(o_ref.dtype)


def build_patch_pos_tables(row_table, col_table, *, compute_dtype=None):
    """Hoisted out of the per-call path: depends only on the (static) embedding weights.
    Builds the merged block-diagonal table and the selector/within helper rows.
    Pass compute_dtype=jnp.bfloat16 when activations are bf16 to halve MXU pushes."""
    depth, E = row_table.shape
    assert col_table.shape == (depth, E)
    f32 = jnp.float32
    if compute_dtype is None:
        compute_dtype = row_table.dtype

    # Lane folding factor.
    if E < 128 and 128 % E == 0:
        L = 128 // E
    else:
        L = 1                      # E >= 128 (or awkward E): one patch per dense row
    lane = L * E
    n_slots = 2 * L                # L row-index slots + L col-index slots per dense row
    K = n_slots * depth

    # Merged block-diagonal table: rows [j*depth,(j+1)*depth) = row_table into lanes j*E..;
    # rows [(L+k)*depth, ...) = col_table into lanes k*E.. .  Built with two einsums instead
    # of 2L dynamic-update-slices.
    eyeL = jnp.eye(L, dtype=f32)
    row_blk = jnp.einsum("jk,de->jdke", eyeL, row_table.astype(f32)).reshape(L * depth, lane)
    col_blk = jnp.einsum("jk,de->jdke", eyeL, col_table.astype(f32)).reshape(L * depth, lane)
    big = jnp.concatenate([row_blk, col_blk], axis=0).astype(compute_dtype)      # (K, lane)

    # Selector (slot j -> lanes [j*depth,(j+1)*depth)) and within-block lane index (k % depth).
    k_iota = jnp.arange(K)
    sel = (k_iota[None, :] // depth == jnp.arange(n_slots)[:, None]).astype(f32)  # (n_slots, K)
    within = (k_iota % depth).astype(f32)[None, :]                                # (1, K)
    aux = jnp.concatenate([sel, within], axis=0)                                  # (n_slots+1, K)

    return dict(big=big, aux=aux, depth=depth, E=E, L=L, lane=lane,
                n_slots=n_slots, K=K)


def patch_position_encoding(input_ids, pos, tables, *, tm_dense=512,
                            vmem_budget_bytes=10 * 1024 * 1024):
    """input_ids: [B, S, E]; pos = ((row_from, row_to), (col_from, col_to)), each [B, S];
    tables: output of build_patch_pos_tables (built once, outside the per-step path)."""
    (row_from, row_to), (col_from, col_to) = pos
    B, S, E = input_ids.shape
    assert E == tables["E"]
    depth, L, lane = tables["depth"], tables["L"], tables["lane"]
    n_slots, K = tables["n_slots"], tables["K"]
    big, aux = tables["big"], tables["aux"]
    f32 = jnp.float32

    M = B * S
    M_dense = -(-M // L)            # cdiv(M, L) — NO round-up to the tile size
    M_pad = M_dense * L             # padding only when L does not divide M (< L rows)

    x_flat = input_ids.reshape(M, E)
    if M_pad != M:
        padn = M_pad - M
        x_flat = jnp.pad(x_flat, ((0, padn), (0, 0)))
        pad1 = lambda a: jnp.pad(a.reshape(M).astype(f32), (0, padn))
    else:
        pad1 = lambda a: a.reshape(M).astype(f32)

    # Slot layout: [from(row 0..L-1), from(col 0..L-1), to(row 0..L-1), to(col 0..L-1)]
    rf, rt = pad1(row_from).reshape(M_dense, L), pad1(row_to).reshape(M_dense, L)
    cf, ct = pad1(col_from).reshape(M_dense, L), pad1(col_to).reshape(M_dense, L)
    pos_packed = jnp.concatenate([rf, cf, rt, ct], axis=1)        # (M_dense, 2*n_slots)
    x_dense = x_flat.reshape(M_dense, lane)

    # ---- tile sizing: cdiv grid (partial last block OK), >= 8 steps target for v7x's two
    #      TensorCores, 128-row floor to keep per-step overhead amortized, honest VMEM cap ----
    db = jnp.dtype(input_ids.dtype).itemsize
    tab_db = jnp.dtype(big.dtype).itemsize
    fixed_bytes = 2 * (K * lane * tab_db + (n_slots + 1) * K * 4)          # resident tables (x2 buf)
    per_row_bytes = (2 * (2 * lane * db + 2 * n_slots * 4)                  # x+out+pos, double-buffered
                     + 6 * max(K, lane) * 4)                                # in-kernel f32 temporaries
    tm_cap_vmem = max(8, ((vmem_budget_bytes - fixed_bytes) // per_row_bytes) // 8 * 8)

    TM_MIN, TARGET_STEPS = 128, 8
    tm_for_steps = _round_up(max(1, -(-M_dense // TARGET_STEPS)), 8)
    tm_d = min(tm_dense, max(TM_MIN, tm_for_steps), tm_cap_vmem)
    tm_d = max(8, (tm_d // 8) * 8)
    if tm_d >= M_dense:
        tm_d = M_dense             # single full-dim block (legal even if not a multiple of 8)
    grid = (pl.cdiv(M_dense, tm_d),)

    cp = dict(dimension_semantics=("parallel",))
    est_bytes = fixed_bytes + tm_d * per_row_bytes
    if est_bytes > 12 * 1024 * 1024:
        cp["vmem_limit_bytes"] = int(min(64 * 1024 * 1024, est_bytes + (4 << 20)))

    pos_spec = pl.BlockSpec((tm_d, 2 * n_slots), lambda i: (i, 0))
    x_spec = pl.BlockSpec((tm_d, lane), lambda i: (i, 0))
    tab_spec = pl.BlockSpec((K, lane), lambda i: (0, 0))           # constant index_map: one DMA
    aux_spec = pl.BlockSpec((n_slots + 1, K), lambda i: (0, 0))

    out_dense = pl.pallas_call(
        functools.partial(_patch_pos_kernel, depth=depth, n_slots=n_slots),
        out_shape=jax.ShapeDtypeStruct((M_dense, lane), input_ids.dtype),
        grid_spec=pltpu.PrefetchScalarGridSpec(
            num_scalar_prefetch=0,
            grid=grid,
            in_specs=[pos_spec, x_spec, tab_spec, aux_spec],
            out_specs=x_spec,
        ),
        compiler_params=pltpu.CompilerParams(**cp),
    )(pos_packed, x_dense, big, aux)

    if M_pad != M:
        return out_dense.reshape(M_pad, E)[:M].reshape(B, S, E)
    return out_dense.reshape(B, S, E)     # no padding -> reshape only, no extra HBM pass


def _reference(input_ids, pos, row_table, col_table, discretize_depth):
    (row_from, row_to), (col_from, col_to) = pos
    dd = float(discretize_depth)
    rf, rt = jnp.round(row_from * dd), jnp.round(row_to * dd)
    cf, ct = jnp.round(col_from * dd), jnp.round(col_to * dd)
    row_idx = jnp.round((rf + rt) / 2.0).astype(jnp.int32)
    col_idx = jnp.round((cf + ct) / 2.0).astype(jnp.int32)
    return input_ids + row_table[row_idx] + col_table[col_idx]


if __name__ == "__main__":
    # Small config consistent with the module: layer_width=32, discretize_depth=16, S=8 patches.
    B, S, E = 2, 8, 32
    DISCRETIZE_DEPTH = 16

    key = jax.random.PRNGKey(0)
    k_x, k_rt, k_ct, k_rf, k_cf, k_rw, k_cw = jax.random.split(key, 7)

    input_ids = jax.random.normal(k_x, (B, S, E), dtype=jnp.float32)

    # Normalized patch-position intervals in [0, 1); keep indices strictly < depth.
    row_from = jax.random.uniform(k_rf, (B, S), dtype=jnp.float32) * 0.5
    col_from = jax.random.uniform(k_cf, (B, S), dtype=jnp.float32) * 0.5
    row_to = row_from + jax.random.uniform(k_rt, (B, S), dtype=jnp.float32) * 0.4
    col_to = col_from + jax.random.uniform(k_ct, (B, S), dtype=jnp.float32) * 0.4
    pos = ((row_from, row_to), (col_from, col_to))

    # nn.Embedding default init: N(0, 1).
    row_table = jax.random.normal(k_rw, (DISCRETIZE_DEPTH, E), dtype=jnp.float32)
    col_table = jax.random.normal(k_cw, (DISCRETIZE_DEPTH, E), dtype=jnp.float32)

    # Table construction hoisted out of the per-call path (depends only on static weights).
    tables = build_patch_pos_tables(row_table, col_table)
    assert tables["depth"] == DISCRETIZE_DEPTH

    encode = jax.jit(lambda x, p: patch_position_encoding(x, p, tables))
    out = jax.block_until_ready(encode(input_ids, pos))

    ref = _reference(input_ids, pos, row_table, col_table, DISCRETIZE_DEPTH)
    assert out.shape == (B, S, E) and out.dtype == jnp.float32
    assert jnp.allclose(out, ref, atol=1e-5, rtol=1e-5), "mismatch vs JAX reference"

    print("KERNEL_OK")
</pallas_src>

<mosaic_0001>
module attributes {stable_mosaic.version = 11 : i64} {
  func.func @_patch_pos_kernel(%arg0: i32, %arg1: memref<4x16xf32, #tpu.memory_space<vmem>>, %arg2: memref<4x128xf32, #tpu.memory_space<vmem>>, %arg3: memref<128x128xf32, #tpu.memory_space<vmem>>, %arg4: memref<9x128xf32, #tpu.memory_space<vmem>>, %arg5: memref<4x128xf32, #tpu.memory_space<vmem>>) attributes {dimension_semantics = [#tpu.dimension_semantics<parallel>], iteration_bounds = array<i64: 1>, scalar_prefetch = 0 : i64, scratch_operands = 0 : i64, tpu.core_type = #tpu.core_type<tc>, window_params = [{transform_indices = @transform_0, window_bounds = array<i64: 4, 16>}, {transform_indices = @transform_1, window_bounds = array<i64: 4, 128>}, {pipeline_mode = #tpu.pipeline_mode<synchronous>, transform_indices = @transform_2, window_bounds = array<i64: 128, 128>}, {pipeline_mode = #tpu.pipeline_mode<synchronous>, transform_indices = @transform_3, window_bounds = array<i64: 9, 128>}, {transform_indices = @transform_4, window_bounds = array<i64: 4, 128>}]} {
    %c0 = arith.constant 0 : index
    %c0_0 = arith.constant 0 : index
    %0 = vector.load %arg1[%c0, %c0_0] : memref<4x16xf32, #tpu.memory_space<vmem>>, vector<4x16xf32>
    %cst = arith.constant 1.600000e+01 : f32
    %1 = vector.broadcast %cst : f32 to vector<4x16xf32>
    %2 = arith.mulf %0, %1 : vector<4x16xf32>
    %3 = math.roundeven %2 : vector<4x16xf32>
    %4 = vector.extract_strided_slice %3 {offsets = [0, 0], sizes = [4, 8], strides = [1, 1]} : vector<4x16xf32> to vector<4x8xf32>
    %5 = vector.extract_strided_slice %3 {offsets = [0, 8], sizes = [4, 8], strides = [1, 1]} : vector<4x16xf32> to vector<4x8xf32>
    %6 = arith.addf %4, %5 : vector<4x8xf32>
    %cst_1 = arith.constant 5.000000e-01 : f32
    %7 = vector.broadcast %cst_1 : f32 to vector<4x8xf32>
    %8 = arith.mulf %6, %7 : vector<4x8xf32>
    %9 = math.roundeven %8 : vector<4x8xf32>
    %cst_2 = arith.constant 0.000000e+00 : f32
    %cst_3 = arith.constant 1.500000e+01 : f32
    %10 = vector.broadcast %cst_2 : f32 to vector<4x8xf32>
    %11 = arith.maximumf %10, %9 : vector<4x8xf32>
    %12 = vector.broadcast %cst_3 : f32 to vector<4x8xf32>
    %13 = arith.minimumf %12, %11 : vector<4x8xf32>
    %c0_4 = arith.constant 0 : index
    %c0_5 = arith.constant 0 : index
    %14 = vector.load %arg4[%c0_4, %c0_5] : memref<9x128xf32, #tpu.memory_space<vmem>>, vector<8x128xf32>
    %c8 = arith.constant 8 : index
    %c0_6 = arith.constant 0 : index
    %15 = vector.load %arg4[%c8, %c0_6] : memref<9x128xf32, #tpu.memory_space<vmem>>, vector<1x128xf32>
    %cst_7 = arith.constant dense<0.000000e+00> : vector<4x128xf32>
    %16 = tpu.matmul %13, %14, %cst_7 {dimension_numbers = #tpu.dot_dimension_numbers<[1], [0], [0], [1], [0, 0, 1, 1], [], []>} : vector<4x8xf32>, vector<8x128xf32>, vector<4x128xf32> -> vector<4x128xf32>
    %17 = vector.broadcast %15 : vector<1x128xf32> to vector<4x128xf32>
    %18 = arith.subf %16, %17 : vector<4x128xf32>
    %19 = math.absf %18 : vector<4x128xf32>
    %cst_8 = arith.constant 5.000000e-01 : f32
    %20 = vector.broadcast %cst_8 : f32 to vector<4x128xf32>
    %21 = arith.cmpf olt, %19, %20 : vector<4x128xf32>
    %22 = arith.extui %21 : vector<4x128xi1> to vector<4x128xi32>
    %23 = arith.sitofp %22 : vector<4x128xi32> to vector<4x128xf32>
    %c0_9 = arith.constant 0 : index
    %c0_10 = arith.constant 0 : index
    %24 = vector.load %arg3[%c0_9, %c0_10] : memref<128x128xf32, #tpu.memory_space<vmem>>, vector<128x128xf32>
    %cst_11 = arith.constant dense<0.000000e+00> : vector<4x128xf32>
    %25 = tpu.matmul %23, %24, %cst_11 {dimension_numbers = #tpu.dot_dimension_numbers<[1], [0], [0], [1], [0, 0, 1, 1], [], []>} : vector<4x128xf32>, vector<128x128xf32>, vector<4x128xf32> -> vector<4x128xf32>
    %c0_12 = arith.constant 0 : index
    %c0_13 = arith.constant 0 : index
    %26 = vector.load %arg2[%c0_12, %c0_13] : memref<4x128xf32, #tpu.memory_space<vmem>>, vector<4x128xf32>
    %27 = arith.addf %26, %25 : vector<4x128xf32>
    %c0_14 = arith.constant 0 : index
    %c0_15 = arith.constant 0 : index
    %28 = vector.load %arg5[%c0_14, %c0_15] : memref<4x128xf32, #tpu.memory_space<vmem>>, vector<4x128xf32>
    tpu.vector_store %arg5[%c0_14, %c0_15], %27 {strides = array<i32>} : memref<4x128xf32, #tpu.memory_space<vmem>>, vector<4x128xf32>,
    return
  }
  func.func @transform_0(%arg0: i32) -> (i32, i32) {
    %c0_i32 = arith.constant 0 : i32
    %c0_i32_0 = arith.constant 0 : i32
    return %arg0, %c0_i32 : i32, i32
  }
  func.func @transform_1(%arg0: i32) -> (i32, i32) {
    %c0_i32 = arith.constant 0 : i32
    %c0_i32_0 = arith.constant 0 : i32
    return %arg0, %c0_i32 : i32, i32
  }
  func.func @transform_2(%arg0: i32) -> (i32, i32) {
    %c0_i32 = arith.constant 0 : i32
    %c0_i32_0 = arith.constant 0 : i32
    %c0_i32_1 = arith.constant 0 : i32
    return %c0_i32, %c0_i32_0 : i32, i32
  }
  func.func @transform_3(%arg0: i32) -> (i32, i32) {
    %c0_i32 = arith.constant 0 : i32
    %c0_i32_0 = arith.constant 0 : i32
    %c0_i32_1 = arith.constant 0 : i32
    return %c0_i32, %c0_i32_0 : i32, i32
  }
  func.func @transform_4(%arg0: i32) -> (i32, i32) {
    %c0_i32 = arith.constant 0 : i32
    %c0_i32_0 = arith.constant 0 : i32
    return %arg0, %c0_i32 : i32, i32
  }
}

</mosaic_0001>

<bundles_post_ra>
// kernel: _lambda_.1
= control target key start
LH: loop header
LB: loop body
LE: loop exit
PB: predicated region body
PF: predicated region fallthrough
CT: control target
= control target key end

     0   :  { %9 = vsyncpa [#allocation3], 0  ;;  %s172_s18 = smov [#allocation2]   ;;  %s173_s20 = smov 128   ;;  %s220_s0 = inlined_call_operand.vmem [shape: f32[4,16], index: 0, kind: input, shape index: {}]   ;;  %s221_s1 = inlined_call_operand.vmem [shape: f32[4,128], index: 1, kind: input, shape index: {}]   ;;  %s222_s2 = inlined_call_operand.hbm [shape: f32[128,128], index: 2, kind: input, shape index: {}]   ;;  %s223_s3 = inlined_call_operand.vmem [shape: f32[9,128], index: 3, kind: input, shape index: {}]   ;;  %s224_s4 = inlined_call_operand.vmem [shape: f32[4,128], index: 4, kind: output, shape index: {}]  }
   0x1   :  { %s18_s17 = sshll.u32 %s222_s2, 4  ;;  %s20_s19 = sshll.u32 %s172_s18, 4  ;;  %s19_s17 = int_to_ptr.hbm [resolvable:$true] %s18_s17  ;;  %s21_s19 = int_to_ptr.vmem [resolvable:$true] %s20_s19 }
   0x2   :  { %s174_s21 = smov 8  }
   0x3   :  { %26 = dma.hbm_to_vmem [thread:$0]  %s19_s17, 2048, %s21_s19, [#allocation3], %s173_s20, %s173_s20, %s174_s21  }
   0x4   :  { %170 = dma.done.wait [#allocation3], 2048  }
   0x5   :  { %171 = vsyncadd [#allocation3], 4294965248  ;;  %v33_v0 = vld [vmem:[%s220_s0] sm:$0xf]  ;;  %s175_s2 = smov 120   ;;  %v92_v10 = vld [vmem:[#allocation2 + $0x78] sm:$0xff] }
   0x6   :  { %v34_v1 = vmul.f32 16.0, %v33_v0  ;;  %v45_v9 = vld [vmem:[%s223_s3] sm:$0xff]  ;;  %v91_v11 = vld [vmem:[#allocation2 + $0x70] sm:$0xff]  ;;  %93 = vmatpush.msra.mxu1 %v92_v10  ;;  %v90_v12 = vld [vmem:[#allocation2 + $0x68] sm:$0xff]  ;;  %vm47_vm2 = vcmask 64512   ;;  %v176_v42 = vmov 1.0  }
   0x7   :  { %66 = vmatpush.msra.mxu0 %v45_v9  ;;  %v89_v13 = vld [vmem:[#allocation2 + $0x60] sm:$0xff]  ;;  %v88_v14 = vld [vmem:[#allocation2 + $0x58] sm:$0xff]  ;;  %v87_v15 = vld [vmem:[#allocation2 + $0x50] sm:$0xff] }
   0x8   :  { %v126_v2 = vcvt.f32.s32 %v34_v1  ;;  %v124_v3 = vand.u32 2147483647, %v34_v1  ;;  %v129_v5 = vand.u32 2147483648, %v34_v1  ;;  %94 = vmatpush.msra.mxu1 %v91_v11  ;;  %v86_v16 = vld [vmem:[#allocation2 + $0x48] sm:$0xff]  ;;  %v85_v17 = vld [vmem:[#allocation2 + $0x40] sm:$0xff]  ;;  %v84_v19 = vld [vmem:[#allocation2 + $0x38] sm:$0xff] }
   0x9   :  { %v83_v21 = vld [vmem:[#allocation2 + $0x30] sm:$0xff]  ;;  %v82_v23 = vld [vmem:[#allocation2 + $0x28] sm:$0xff]  ;;  %v81_v25 = vld [vmem:[#allocation2 + $0x20] sm:$0xff] }
   0xa   :  { %v127_v4 = vcvt.s32.f32 %v126_v2  ;;  %vm125_vm0 = vcmp.lt.f32.partialorder %v124_v3, 8388608.0  ;;  %95 = vmatpush.msra.mxu1 %v90_v12  ;;  %v80_v28 = vld [vmem:[#allocation2 + $0x18] sm:$0xff]  ;;  %v79_v35 = vld [vmem:[#allocation2 + $0x10] sm:$0xff]  ;;  %v78_v36 = vld [vmem:[#allocation2 + $0x8] sm:$0xff] }
   0xb   :  { %v77_v37 = vld [vmem:[#allocation2] sm:$0xff]  ;;  %v145_v38 = vld [vmem:[%s223_s3 + $0x8] ss:$0 sm:$0xff] }
   0xc   :  { %v128_v6 = vand.u32 2147483647, %v127_v4  ;;  %96 = vmatpush.msra.mxu1 %v89_v13  ;;  %v113_v43 = vld [vmem:[%s221_s1] sm:$0xf] }
   0xe   :  { %v130_v7 = vor.u32 %v129_v5, %v128_v6  ;;  %97 = vmatpush.msra.mxu1 %v88_v14 }
  0x10   :  { %v131_v8 = vsel %vm125_vm0, %v130_v7, %v34_v1  ;;  %98 = vmatpush.msra.mxu1 %v87_v15 }
  0x11   :  { %37 = vrot.lane.b32.xlu0 %v131_v8, %s175_s2 }
  0x12   :  { %99 = vmatpush.msra.mxu1 %v86_v16 }
  0x14   :  { %100 = vmatpush.msra.mxu1 %v85_v17 }
  0x16   :  { %101 = vmatpush.msra.mxu1 %v84_v19 }
  0x18   :  { %102 = vmatpush.msra.mxu1 %v83_v21 }
  0x1a   :  { %103 = vmatpush.msra.mxu1 %v82_v23 }
  0x1c   :  { %104 = vmatpush.msra.mxu1 %v81_v25 }
  0x1e   :  { %105 = vmatpush.msra.mxu1 %v80_v28 }
  0x20   :  { %106 = vmatpush.msra.mxu1 %v79_v35 }
  0x22   :  { %107 = vmatpush.msra.mxu1 %v78_v36 }
  0x24   :  { %108 = vmatpush.msra.mxu1 %v77_v37 }
  0x83   :  { %v38_v18 = vpop.permute.xlu0 %37 }
  0x84   :  { %v40_v20 = vadd.f32 %v131_v8, %v38_v18 }
  0x86   :  { %v41_v22 = vmul.f32 0.5, %v40_v20 }
  0x88   :  { %v134_v24 = vcvt.f32.s32 %v41_v22  ;;  %v132_v27 = vand.u32 2147483647, %v41_v22  ;;  %v137_v30 = vand.u32 2147483648, %v41_v22 }
  0x8a   :  { %v135_v26 = vcvt.s32.f32 %v134_v24  ;;  %vm133_vm1 = vcmp.lt.f32.partialorder %v132_v27, 8388608.0 }
  0x8c   :  { %v136_v29 = vand.u32 2147483647, %v135_v26 }
  0x8e   :  { %v138_v31 = vor.u32 %v137_v30, %v136_v29 }
  0x90   :  { %v139_v32 = vsel %vm133_vm1, %v138_v31, %v41_v22 }
  0x91   :  { %v43_v33 = vmax.f32 %v139_v32, 0.0 }
  0x93   :  { %v44_v34 = vmin.f32 %v43_v33, 15.0 }
  0x95   :  { %121 = vmatmul.msk.f32.vlgmr.msra.gmra.mxu0 %vm47_vm2, %v44_v34 }
 0x112   :  { %v68_v39 = vpop.f32.mrf.mxu0 }
 0x113   :  { %v72_v40 = vsub.f32 %v68_v39, %v145_v38 }
 0x115   :  { %v73_v41 = vand.u32 2147483647, %v72_v40 }
 0x117   :  { %vm74_vm3 = vcmp.lt.f32.partialorder %v73_v41, 0.5 }
 0x118   :  { %123 = vmatmul.msk.f32.vlgmr.msra.gmra.mxu1 %vm74_vm3, %v176_v42 }
 0x195   :  { %v110_v44 = vpop.f32.mrf.mxu1 }
 0x196   :  { %v114_v45 = vadd.f32 %v113_v43, %v110_v44 }
 0x198   :  { %115 = vst [vmem:[%s224_s4] sm:$0xf] %v114_v45 }
 0x199   :  { %120 = vsyncpa [#allocation3], 1 }

</bundles_post_ra>
